<compile_context>
chip_gen: v6e
topology: v6e:2x2x1
jax: 0.10.0
libtpu: 0.0.40
codegen_flags: <defaults>
</compile_context>

<pallas_src>
import math
import numpy as np
import jax
import jax.numpy as jnp
from jax import lax
from jax.experimental import pallas as pl
from jax.experimental.pallas import tpu as pltpu


LANE = 128                    # lane-dense feature padding
ROW = 16                      # row-tile unit (bf16-native (16,128) packing)
TILE_ROWS_MAX = 512           # max dst / src row tile (fits v7x 64 MiB budget)
COMPUTE_DTYPE = jnp.bfloat16  # MXU input dtype (f32 accumulation)


def _round_up(x, m):
    return (x + m - 1) // m * m


def _pick_row_tile(n, tmax=TILE_ROWS_MAX):
    """Row tile + padded row count.  The SAME function is used for dst rows of
    layer l and src rows of layer l+1 (they are the same node set), so the
    padded counts line up and layer l's output feeds layer l+1 directly."""
    if n <= tmax:
        t = _round_up(n, ROW)
        return t, t           # single tile == full (padded) extent
    return tmax, _round_up(n, tmax)


def _vmem_limit(estimate_bytes):
    # Raise the scoped-VMEM limit above the per-generation default (16 MiB on
    # v5e, 32 MiB on v6e/v7x) when the resident tiles need it, but never ask
    # for more than v7x's 64 MiB per-core physical VMEM.
    return int(min(max(estimate_bytes, 32 << 20), 64 << 20))


# ---------------------------------------------------------------------------
# Phase 1 kernel: n = relu(h_src @ Qw + Qb), tiled over src rows.
# The padded Qb has 1.0 at lane `ws_lane`, so n[:, ws_lane] == 1.0 and the
# downstream aggregation matmul produces the edge-weight sums "for free".
# This kernel also performs the single bf16 cast of h for the whole layer.
# ---------------------------------------------------------------------------
def _n_kernel(h_ref, qw_ref, qb_ref, n_ref):
    h = h_ref[...].astype(COMPUTE_DTYPE)                       # bf16 [tk, Hp]
    n = jnp.dot(h, qw_ref[...], preferred_element_type=jnp.float32)
    n = jnp.maximum(n + qb_ref[...], 0.0)                      # f32, relu
    n_ref[...] = n.astype(COMPUTE_DTYPE)


# ---------------------------------------------------------------------------
# Phase 2 kernel: weighted aggregation + W + L2 normalize.
# grid = (dst_tiles "parallel", src/K tiles "arbitrary"), f32 accumulator.
# ---------------------------------------------------------------------------
def _make_agg_kernel(ws_lane):
    def kernel(a_ref, n_ref, hdst_ref, w1_ref, w2_ref, wb_ref, o_ref, acc_ref):
        k = pl.program_id(1)

        @pl.when(k == 0)
        def _():
            acc_ref[...] = jnp.zeros_like(acc_ref)

        # MXU: agg (and ws at lane `ws_lane`) accumulated in f32.
        acc_ref[...] += jnp.dot(a_ref[...], n_ref[...],
                                preferred_element_type=jnp.float32)

        @pl.when(k == pl.num_programs(1) - 1)
        def _():
            agg = acc_ref[...]                                 # f32 [tm, Hp]
            ws = agg[:, ws_lane:ws_lane + 1]                   # f32 [tm, 1]
            inv_ws = pl.reciprocal(jnp.maximum(ws, 1.0), approx=True)   # EUP
            aggn = (agg * inv_ws).astype(COMPUTE_DTYPE)
            hdst = hdst_ref[...].astype(COMPUTE_DTYPE)         # only D rows
            # concat([agg/ws, h_dst]) @ W  as two f32-accumulated dots
            # (no [tm, 2Hp] bf16 concat materialization).
            z = jnp.dot(aggn, w1_ref[...], preferred_element_type=jnp.float32)
            z = z + jnp.dot(hdst, w2_ref[...],
                            preferred_element_type=jnp.float32)
            z = jnp.maximum(z + wb_ref[...], 0.0)              # f32 [tm, Hp]
            # row-wise L2 normalization via rsqrt (norm 0 -> divide by 1)
            ss = jnp.sum(z * z, axis=1, keepdims=True)
            inv_norm = jnp.where(ss == 0.0, 1.0, lax.rsqrt(ss))
            o_ref[...] = z * inv_norm
    return kernel


# ---------------------------------------------------------------------------
# One-time preparation: pad + cast blocks and weights, build the tiling plan.
# (Hoisted out of the per-forward path per review.)
# ---------------------------------------------------------------------------
def prepare_sagenet(blocks, params, hidden_dims):
    assert len(blocks) == len(params)
    hid = hidden_dims
    # Reserve one spare lane (index `hid`) for the ws-harvest column.  If hid
    # is already a multiple of 128 this adds one extra 128-lane group.
    h_pad = _round_up(hid + 1, LANE)
    ws_lane = hid

    layers = []
    prev_true = None
    for a, (qw, qb, w_full, wb) in zip(blocks, params):
        num_dst, num_src = a.shape
        if prev_true is not None:
            assert num_src == prev_true, "block src count must match previous h"
        assert num_dst <= num_src, "dst nodes must be a prefix of src nodes"

        tm, dst_pad = _pick_row_tile(num_dst)
        tk, src_pad = _pick_row_tile(num_src)

        a_p = jnp.zeros((dst_pad, src_pad), jnp.float32)
        a_p = a_p.at[:num_dst, :num_src].set(a).astype(COMPUTE_DTYPE)

        qw_p = jnp.zeros((h_pad, h_pad), jnp.float32)
        qw_p = qw_p.at[:hid, :hid].set(qw).astype(COMPUTE_DTYPE)
        # 1.0 at the ws-harvest lane -> n[:, ws_lane] == relu(0 + 1) == 1.
        qb_p = jnp.zeros((1, h_pad), jnp.float32).at[:, :hid].set(qb)
        qb_p = qb_p.at[0, ws_lane].set(1.0)

        # W acts on concat([agg/ws, h_dst]); split into two [Hp, Hp] halves.
        w1_p = jnp.zeros((h_pad, h_pad), jnp.float32)
        w1_p = w1_p.at[:hid, :hid].set(w_full[:hid]).astype(COMPUTE_DTYPE)
        w2_p = jnp.zeros((h_pad, h_pad), jnp.float32)
        w2_p = w2_p.at[:hid, :hid].set(w_full[hid:]).astype(COMPUTE_DTYPE)
        wb_p = jnp.zeros((1, h_pad), jnp.float32).at[:, :hid].set(wb)

        layers.append(dict(num_dst=num_dst, num_src=num_src,
                           tm=tm, dst_pad=dst_pad, tk=tk, src_pad=src_pad,
                           a=a_p, qw=qw_p, qb=qb_p,
                           w1=w1_p, w2=w2_p, wb=wb_p))
        prev_true = num_dst

    return dict(layers=layers, hid=hid, h_pad=h_pad, ws_lane=ws_lane)


# ---------------------------------------------------------------------------
# Forward: only h is padded per call; each layer = two tiled pallas_calls.
# ---------------------------------------------------------------------------
def sage_net_forward(prepared, h):
    hid = prepared["hid"]
    h_pad = prepared["h_pad"]
    layers = prepared["layers"]
    agg_kernel = _make_agg_kernel(prepared["ws_lane"])

    num_src0 = h.shape[0]
    assert h.shape[1] == hid
    assert num_src0 == layers[0]["num_src"]

    h_p = jnp.zeros((layers[0]["src_pad"], h_pad), jnp.float32)
    h_p = h_p.at[:num_src0, :hid].set(h.astype(jnp.float32))

    for L in layers:
        tm, tk = L["tm"], L["tk"]
        dst_pad, src_pad = L["dst_pad"], L["src_pad"]

        # ---- phase 1: n = relu(Q h_src), bf16, ws column at lane `hid` ----
        n_est = 2 * (tk * h_pad * 4 + h_pad * h_pad * 2 + h_pad * 4
                     + tk * h_pad * 2) + (1 << 20)
        n_p = pl.pallas_call(
            _n_kernel,
            out_shape=jax.ShapeDtypeStruct((src_pad, h_pad), COMPUTE_DTYPE),
            grid_spec=pltpu.PrefetchScalarGridSpec(
                num_scalar_prefetch=0,
                grid=(src_pad // tk,),
                in_specs=[pl.BlockSpec((tk, h_pad), lambda s: (s, 0)),
                          pl.BlockSpec((h_pad, h_pad), lambda s: (0, 0)),
                          pl.BlockSpec((1, h_pad), lambda s: (0, 0))],
                out_specs=pl.BlockSpec((tk, h_pad), lambda s: (s, 0)),
            ),
            compiler_params=pltpu.CompilerParams(
                dimension_semantics=("parallel",),
                vmem_limit_bytes=_vmem_limit(n_est)),
        )(h_p, L["qw"], L["qb"])

        # ---- phase 2: tiled aggregation + W + normalize ----
        agg_est = (2 * (tm * tk * 2 + tk * h_pad * 2 + tm * h_pad * 4
                        + 2 * h_pad * h_pad * 2 + h_pad * 4 + tm * h_pad * 4)
                   + tm * h_pad * 4 + (1 << 20))
        h_p = pl.pallas_call(
            agg_kernel,
            out_shape=jax.ShapeDtypeStruct((dst_pad, h_pad), jnp.float32),
            grid_spec=pltpu.PrefetchScalarGridSpec(
                num_scalar_prefetch=0,
                grid=(dst_pad // tm, src_pad // tk),
                in_specs=[pl.BlockSpec((tm, tk), lambda i, k: (i, k)),      # A
                          pl.BlockSpec((tk, h_pad), lambda i, k: (k, 0)),   # n
                          pl.BlockSpec((tm, h_pad), lambda i, k: (i, 0)),   # h_dst
                          pl.BlockSpec((h_pad, h_pad), lambda i, k: (0, 0)),  # W1
                          pl.BlockSpec((h_pad, h_pad), lambda i, k: (0, 0)),  # W2
                          pl.BlockSpec((1, h_pad), lambda i, k: (0, 0))],     # Wb
                out_specs=pl.BlockSpec((tm, h_pad), lambda i, k: (i, 0)),
                scratch_shapes=[pltpu.VMEM((tm, h_pad), jnp.float32)],
            ),
            compiler_params=pltpu.CompilerParams(
                dimension_semantics=("parallel", "arbitrary"),
                vmem_limit_bytes=_vmem_limit(agg_est)),
        )(L["a"], n_p, h_p, L["w1"], L["w2"], L["wb"])
        # h_p now has dst_pad rows == next layer's src_pad rows.

    last = layers[-1]
    return h_p[:last["num_dst"], :hid]


# ---------------------------------------------------------------------------
# Parameter init (matches reset_parameters: xavier_uniform, gain=sqrt(2) for
# relu, zero biases).  Weights stored pre-transposed [in, out].
# ---------------------------------------------------------------------------
def _xavier_uniform(key, fan_in, fan_out, gain):
    bound = gain * math.sqrt(6.0 / (fan_in + fan_out))
    w = jax.random.uniform(key, (fan_out, fan_in), jnp.float32, -bound, bound)
    return w.T


def init_sagenet_params(key, hidden_dims, n_layers):
    gain = math.sqrt(2.0)  # calculate_gain('relu')
    params = []
    for _ in range(n_layers):
        key, kq, kw = jax.random.split(key, 3)
        qw = _xavier_uniform(kq, hidden_dims, hidden_dims, gain)          # [H, H]
        qb = jnp.zeros((1, hidden_dims), jnp.float32)
        w_full = _xavier_uniform(kw, 2 * hidden_dims, hidden_dims, gain)  # [2H, H]
        wb = jnp.zeros((1, hidden_dims), jnp.float32)
        params.append((qw, qb, w_full, wb))
    return params


# Pure-JAX f32 reference for verification.
def _reference(blocks, h, layer_params):
    for a, (qw, qb, w_full, wb) in zip(blocks, layer_params):
        num_dst = a.shape[0]
        h_dst = h[:num_dst]
        n = jnp.maximum(h @ qw + qb, 0.0)
        agg = a @ n
        ws = jnp.maximum(jnp.sum(a, axis=1, keepdims=True), 1.0)
        z = jnp.concatenate([agg / ws, h_dst], axis=1) @ w_full + wb
        z = jnp.maximum(z, 0.0)
        z_norm = jnp.sqrt(jnp.sum(z * z, axis=1, keepdims=True))
        z_norm = jnp.where(z_norm == 0.0, 1.0, z_norm)
        h = z / z_norm
    return h


if __name__ == "__main__":
    hidden_dims = 32
    n_layers = 2

    key = jax.random.PRNGKey(0)
    key, kh, kb0, kb1, km0, km1 = jax.random.split(key, 6)

    # Node features for the outermost frontier (16 src nodes, 32 features).
    h = jax.random.normal(kh, (16, hidden_dims), jnp.float32)

    # Dense blocks:  layer 0: 16 src -> 8 dst ;  layer 1: 8 src -> 4 dst.
    def make_block(kw, kmask, num_dst, num_src):
        w = jax.random.uniform(kw, (num_dst, num_src), jnp.float32, 0.0, 2.0)
        mask = (jax.random.uniform(kmask, (num_dst, num_src)) < 0.5)
        return jnp.where(mask, w, 0.0)

    blocks = [make_block(kb0, km0, 8, 16), make_block(kb1, km1, 4, 8)]

    params = init_sagenet_params(key, hidden_dims, n_layers)

    # One-time padding / casting / tiling plan (outside per-forward path).
    prepared = prepare_sagenet(blocks, params, hidden_dims)

    out = sage_net_forward(prepared, h)
    out = jax.block_until_ready(out)

    ref = _reference(blocks, h, params)
    # bf16 MXU inputs (f32 accumulation) -> relaxed tolerance vs. f32 reference.
    if not np.allclose(np.asarray(out), np.asarray(ref), atol=2e-2, rtol=2e-2):
        diff = np.max(np.abs(np.asarray(out) - np.asarray(ref)))
        raise AssertionError(f"Pallas kernel mismatch, max abs diff = {diff}")

    print("KERNEL_OK")
</pallas_src>

<mosaic_0001>
module attributes {stable_mosaic.version = 11 : i64} {
  func.func @_n_kernel(%arg0: i32, %arg1: memref<16x128xf32, #tpu.memory_space<vmem>>, %arg2: memref<128x128xbf16, #tpu.memory_space<vmem>>, %arg3: memref<1x128xf32, #tpu.memory_space<vmem>>, %arg4: memref<16x128xbf16, #tpu.memory_space<vmem>>) attributes {dimension_semantics = [#tpu.dimension_semantics<parallel>], iteration_bounds = array<i64: 1>, scalar_prefetch = 0 : i64, scratch_operands = 0 : i64, tpu.core_type = #tpu.core_type<tc>, window_params = [{transform_indices = @transform_0, window_bounds = array<i64: 16, 128>}, {pipeline_mode = #tpu.pipeline_mode<synchronous>, transform_indices = @transform_1, window_bounds = array<i64: 128, 128>}, {pipeline_mode = #tpu.pipeline_mode<synchronous>, transform_indices = @transform_2, window_bounds = array<i64: 1, 128>}, {transform_indices = @transform_3, window_bounds = array<i64: 16, 128>}]} {
    %c0 = arith.constant 0 : index
    %c0_0 = arith.constant 0 : index
    %0 = vector.load %arg1[%c0, %c0_0] : memref<16x128xf32, #tpu.memory_space<vmem>>, vector<16x128xf32>
    %1 = arith.truncf %0 : vector<16x128xf32> to vector<16x128xbf16>
    %c0_1 = arith.constant 0 : index
    %c0_2 = arith.constant 0 : index
    %2 = vector.load %arg2[%c0_1, %c0_2] : memref<128x128xbf16, #tpu.memory_space<vmem>>, vector<128x128xbf16>
    %cst = arith.constant dense<0.000000e+00> : vector<16x128xf32>
    %3 = tpu.matmul %1, %2, %cst {dimension_numbers = #tpu.dot_dimension_numbers<[1], [0], [0], [1], [0, 0, 1, 1], [], []>} : vector<16x128xbf16>, vector<128x128xbf16>, vector<16x128xf32> -> vector<16x128xf32>
    %c0_3 = arith.constant 0 : index
    %c0_4 = arith.constant 0 : index
    %4 = vector.load %arg3[%c0_3, %c0_4] : memref<1x128xf32, #tpu.memory_space<vmem>>, vector<1x128xf32>
    %5 = vector.broadcast %4 : vector<1x128xf32> to vector<16x128xf32>
    %6 = arith.addf %3, %5 : vector<16x128xf32>
    %cst_5 = arith.constant 0.000000e+00 : f32
    %7 = vector.broadcast %cst_5 : f32 to vector<16x128xf32>
    %8 = arith.maximumf %6, %7 : vector<16x128xf32>
    %9 = arith.truncf %8 : vector<16x128xf32> to vector<16x128xbf16>
    %c0_6 = arith.constant 0 : index
    %c0_7 = arith.constant 0 : index
    %10 = vector.load %arg4[%c0_6, %c0_7] : memref<16x128xbf16, #tpu.memory_space<vmem>>, vector<16x128xbf16>
    tpu.vector_store %arg4[%c0_6, %c0_7], %9 {strides = array<i32>} : memref<16x128xbf16, #tpu.memory_space<vmem>>, vector<16x128xbf16>,
    return
  }
  func.func @transform_0(%arg0: i32) -> (i32, i32) {
    %c0_i32 = arith.constant 0 : i32
    %c0_i32_0 = arith.constant 0 : i32
    return %arg0, %c0_i32 : i32, i32
  }
  func.func @transform_1(%arg0: i32) -> (i32, i32) {
    %c0_i32 = arith.constant 0 : i32
    %c0_i32_0 = arith.constant 0 : i32
    %c0_i32_1 = arith.constant 0 : i32
    return %c0_i32, %c0_i32_0 : i32, i32
  }
  func.func @transform_2(%arg0: i32) -> (i32, i32) {
    %c0_i32 = arith.constant 0 : i32
    %c0_i32_0 = arith.constant 0 : i32
    %c0_i32_1 = arith.constant 0 : i32
    return %c0_i32, %c0_i32_0 : i32, i32
  }
  func.func @transform_3(%arg0: i32) -> (i32, i32) {
    %c0_i32 = arith.constant 0 : i32
    %c0_i32_0 = arith.constant 0 : i32
    return %arg0, %c0_i32 : i32, i32
  }
}

</mosaic_0001>

<bundles_post_ra>
// kernel: tpu_custom_call.1
= control target key start
LH: loop header
LB: loop body
LE: loop exit
PB: predicated region body
PF: predicated region fallthrough
CT: control target
= control target key end

     0   :  { %8 = vsyncpa [#allocation3], 0  ;;  %s366_s0 = inlined_call_operand.hbm [shape: f32[16,128], index: 0, kind: input, shape index: {}]   ;;  %s367_s1 = inlined_call_operand.hbm [shape: bf16[128,128], index: 1, kind: input, shape index: {}]   ;;  %s368_s2 = inlined_call_operand.vmem [shape: f32[1,128], index: 2, kind: input, shape index: {}]   ;;  %s369_s3 = inlined_call_operand.hbm [shape: bf16[16,128], index: 3, kind: output, shape index: {}]  }
   0x1   :  { %9 = vsyncpa [#allocation6], 0 }
   0x2   :  { %10 = vsyncpa [#allocation4], 0  ;;  %s319_s12 = smov [#allocation2]  }
   0x3   :  { %s16_s13 = sshll.u32 %s319_s12, 4  ;;  %s17_s13 = int_to_ptr.vmem [resolvable:$true] %s16_s13 }
   0x4   :  { %s261_s14 = scalar_lea.vmem %s17_s13, 256  ;;  %p266_p1 = scmp.lt.s32.totalorder %s17_s13, %s17_s13 }
   0x5   :  { %p262_p0 = scmp.ne.s32.totalorder %s17_s13, %s261_s14  ;;  %p267_p2 = scmp.lt.s32.totalorder %s261_s14, %s261_s14 }
   0x7   :  { %p268_p3 = por %p267_p2, %p266_p1 }
   0x9   :  { %p269_p4 = pnand %p268_p3, %p262_p0 }
   0xb   :  { %272 = shalt.err (!%p269_p4)
}
   0xc   :  { %s320_s15 = smov 128   ;;  %s321_s16 = smov 8  }
   0xd   :  { %22 = dma.hbm_to_vmem [thread:$0]  %s366_s0, 256, %s17_s13, [#allocation3], %s320_s15, %s320_s15, %s321_s16  }
   0xe   :  { %s322_s19 = smov [#allocation5]  }
   0xf   :  { %s28_s20 = sshll.u32 %s322_s19, 4  ;;  %s29_s20 = int_to_ptr.vmem [resolvable:$true] %s28_s20 }
  0x10   :  { %s281_s21 = scalar_lea.vmem %s29_s20, 1024  ;;  %p286_p6 = scmp.lt.s32.totalorder %s29_s20, %s29_s20 }
  0x11   :  { %p282_p5 = scmp.ne.s32.totalorder %s29_s20, %s281_s21  ;;  %p287_p7 = scmp.lt.s32.totalorder %s281_s21, %s281_s21 }
  0x13   :  { %p288_p8 = por %p287_p7, %p286_p6 }
  0x15   :  { %p289_p9 = pnand %p288_p8, %p282_p5 }
  0x17   :  { %292 = shalt.err (!%p289_p9)
}
  0x18   :  { %s323_s22 = smov 64   ;;  %s324_s23 = smov 4  }
  0x19   :  { %34 = dma.hbm_to_vmem [thread:$0]  %s367_s1, 1024, %s29_s20, [#allocation6], %s323_s22, %s323_s22, %s324_s23  }
  0x1a   :  { %313 = dma.done.wait [#allocation3], 256  }
  0x1b   :  { %314 = vsyncadd [#allocation3], 4294967040 }
  0x1c   :  { %315 = dma.done.wait [#allocation6], 1024  }
  0x1d   :  { %316 = vsyncadd [#allocation6], 4294966272  ;;  %v325_v0 = vmov 0.0   ;;  %vm326_vm0 = vmmov 0   ;;  %v245_v1 = vld [vmem:[#allocation5 + $0x38] sm:$0xff]   ;;  %v246_v2 = vld [vmem:[#allocation5 + $0x30] sm:$0xff]  }
  0x1e   :  { %216 = vmatprep.subr.bf16.mxu0 %v325_v0  ;;  %232 = vmatprep.mubr.msk.bf16.mxu0 %vm326_vm0, %v325_v0  ;;  %v247_v3 = vld [vmem:[#allocation5 + $0x28] sm:$0xff]   ;;  %v248_v4 = vld [vmem:[#allocation5 + $0x20] sm:$0xff]   ;;  %v249_v5 = vld [vmem:[#allocation5 + $0x18] sm:$0xff]   ;;  %s327_s26 = smov [#allocation7]  }
  0x1f   :  { %217 = vmatpush3.bf16.msra.mxu0 %v245_v1  ;;  %v250_v6 = vld [vmem:[#allocation5 + $0x10] sm:$0xff]   ;;  %v251_v7 = vld [vmem:[#allocation5 + $0x8] sm:$0xff]   ;;  %v252_v8 = vld [vmem:[#allocation5] sm:$0xff]   ;;  %s176_s27 = sshll.u32 %s327_s26, 4  ;;  %s177_s27 = int_to_ptr.vmem [resolvable:$true] %s176_s27 }
  0x20   :  { %218 = vmatprep.subr.bf16.mxu0 %v325_v0  ;;  %v44_v9 = vld [vmem:[#allocation2] sm:$0xff]  ;;  %v45_v10 = vld [vmem:[#allocation2 + $0x8] sm:$0xff]  ;;  %s293_s28 = scalar_lea.vmem %s177_s27, 128  ;;  %p298_p11 = scmp.lt.s32.totalorder %s177_s27, %s177_s27 }
  0x21   :  { %v46_v11 = vpack.c.bf16 %v45_v10, %v44_v9  ;;  %v189_v12 = vld [vmem:[%s368_s2] ss:$0 sm:$0xff]  ;;  %p294_p10 = scmp.ne.s32.totalorder %s177_s27, %s293_s28  ;;  %p299_p12 = scmp.lt.s32.totalorder %s293_s28, %s293_s28 }
  0x23   :  { %219 = vmatpush3.bf16.msra.mxu0 %v246_v2  ;;  %p300_p13 = por %p299_p12, %p298_p11 }
  0x24   :  { %220 = vmatprep.subr.bf16.mxu0 %v325_v0 }
  0x25   :  { %p301_p0 = pnand %p300_p13, %p294_p10 }
  0x27   :  { %221 = vmatpush3.bf16.msra.mxu0 %v247_v3 }
  0x28   :  { %222 = vmatprep.subr.bf16.mxu0 %v325_v0 }
  0x2b   :  { %223 = vmatpush3.bf16.msra.mxu0 %v248_v4 }
  0x2c   :  { %224 = vmatprep.subr.bf16.mxu0 %v325_v0 }
  0x2f   :  { %225 = vmatpush3.bf16.msra.mxu0 %v249_v5 }
  0x30   :  { %226 = vmatprep.subr.bf16.mxu0 %v325_v0 }
  0x33   :  { %227 = vmatpush3.bf16.msra.mxu0 %v250_v6 }
  0x34   :  { %228 = vmatprep.subr.bf16.mxu0 %v325_v0 }
  0x37   :  { %229 = vmatpush3.bf16.msra.mxu0 %v251_v7 }
  0x38   :  { %230 = vmatprep.subr.bf16.mxu0 %v325_v0 }
  0x3b   :  { %231 = vmatpush3.bf16.msra.mxu0 %v252_v8 }
  0x3e   :  { %233 = vmatmul.mubr.bf16.vlgmr.msra.gmra.mxu0 %v46_v11 }
  0xfe   :  { %v152_v13 = vpop.f32.mrf.mxu0 }
  0xff   :  { %v153_v15 = vadd.f32 %v189_v12, %v152_v13 }
 0x100   :  { %v234_v14 = vpop.f32.mrf.mxu0 }
 0x101   :  { %v159_v19 = vmax.f32 %v153_v15, 0.0 }
 0x102   :  { %v155_v16 = vpop.f32.mrf.mxu0 }
 0x103   :  { %v156_v17 = vadd.f32 %v189_v12, %v155_v16 }
 0x104   :  { %v235_v18 = vpop.f32.mrf.mxu0 }
 0x105   :  { %v160_v20 = vmax.f32 %v156_v17, 0.0 }
 0x107   :  { %v205_v21 = vpack.c.bf16 %v160_v20, %v159_v19 }
 0x109   :  { %206 = vst [vmem:[#allocation7] sm:$0xff] %v205_v21  }
 0x10a   :  { %304 = shalt.err (!%p301_p0)
}
 0x10b   :  { %182 = dma.vmem_to_hbm [thread:$0]  %s177_s27, 128, %s369_s3, [#allocation4], %s323_s22, %s323_s22, %s324_s23  }
 0x10c   :  { %317 = dma.done.wait [#allocation4], 128  }
 0x10d   :  { %318 = vsyncadd [#allocation4], 4294967168 }
 0x10e   :  { %186 = vsyncpa [#allocation3], 1 }
 0x10f   :  { %187 = vsyncpa [#allocation6], 1 }
 0x110   :  { %188 = vsyncpa [#allocation4], 1 }

</bundles_post_ra>
